<compile_context>
chip_gen: v5e
topology: v5e:2x2
jax: 0.10.0
libtpu: 0.0.40
codegen_flags: <defaults>
</compile_context>

<pallas_src>
import functools

import jax
import jax.numpy as jnp
from jax import lax
from jax.experimental import pallas as pl
from jax.experimental.pallas import tpu as pltpu


def _dsa_kernel(depth_ref, sem_ref, w_ref, b_ref, out_ref, attn_acc, d_acc,
                *, c_half, c_half_p):
    # depth_ref / sem_ref : (C, T)            current HW tile (batch squeezed)
    # w_ref               : (C_half_p, C)     zero-padded 1x1-conv weight
    # b_ref               : (C_half_p, 1)     zero-padded bias
    # out_ref             : (C_half_p, HW)    full spatial extent, resident per b
    # attn_acc            : (C_half_p, C_half_p) f32 logit accumulator
    # d_acc               : (C_half_p, HW)    conv-output cache (input dtype)
    t = pl.program_id(1)
    n_t = pl.num_programs(1)
    tile = depth_ref.shape[-1]

    @pl.when(t == 0)
    def _():
        attn_acc[...] = jnp.zeros_like(attn_acc)

    w = w_ref[...]
    b = b_ref[...]

    # 1x1 conv == channel matmul; native-dtype MXU operands, f32 accumulation.
    d_t = jnp.dot(w, depth_ref[...], preferred_element_type=jnp.float32) + b
    s_t = jnp.dot(w, sem_ref[...], preferred_element_type=jnp.float32) + b

    # Keep subsequent MXU operands in the (possibly narrow) input dtype.
    d_c = d_t.astype(d_acc.dtype)
    s_c = s_t.astype(d_acc.dtype)

    start = t * tile
    if tile % 128 == 0:
        start = pl.multiple_of(start, 128)
    d_acc[:, pl.ds(start, tile)] = d_c

    # Attention logits: contract the HW axis of both operands directly
    # (NT matmul form -> no materialized transpose on the XLU).
    attn_acc[...] += lax.dot_general(
        d_c, s_c,
        dimension_numbers=(((1,), (1,)), ((), ())),
        preferred_element_type=jnp.float32)

    @pl.when(t == n_t - 1)
    def _():
        a = attn_acc[...]
        if c_half_p > c_half:
            # Exclude zero-padded channels from the softmax normalization.
            col = lax.broadcasted_iota(jnp.int32, a.shape, 1)
            a = jnp.where(col < c_half, a, -1e30)
        a = a - jnp.max(a, axis=-1, keepdims=True)
        p = jnp.exp(a)
        p = p * pl.reciprocal(jnp.sum(p, axis=-1, keepdims=True), approx=True)
        d_all = d_acc[...]
        fused = jnp.dot(p.astype(d_all.dtype), d_all,
                        preferred_element_type=jnp.float32)
        out_ref[...] = (fused + d_all.astype(jnp.float32)).astype(out_ref.dtype)


def _pick_hw_tile(hw):
    for t in (2048, 1024, 512, 256, 128):
        if hw % t == 0:
            return t
    return hw


def dynamic_semantic_attention(depth_feat, semantic_feat, weight, bias,
                               hw_tile=None):
    """depth_feat, semantic_feat: (B, C, H, W) NCHW.
    weight: (C//2, C) squeezed 1x1-conv weight, bias: (C//2,).
    Returns (B, C//2, H, W)."""
    B, C, H, W = depth_feat.shape
    C_half = weight.shape[0]
    HW = H * W
    dt = depth_feat.dtype

    if hw_tile is None:
        hw_tile = _pick_hw_tile(HW)
    assert HW % hw_tile == 0, "hw_tile must divide H*W"
    n_hw = HW // hw_tile

    # Pad conv output channels to the sublane granule (8 for 4B dtypes,
    # 16 for 2B) so every vreg row of d / s / attn carries real data.
    itemsize = jnp.dtype(dt).itemsize
    gran = max(8, 32 // itemsize)
    C_half_p = ((C_half + gran - 1) // gran) * gran
    w_p = jnp.zeros((C_half_p, C), dtype=weight.dtype).at[:C_half].set(weight)
    b_p = jnp.zeros((C_half_p, 1), dtype=bias.dtype).at[:C_half, 0].set(bias)

    depth_flat = depth_feat.reshape(B, C, HW)
    sem_flat = semantic_feat.reshape(B, C, HW)

    # Scoped VMEM budget: 2 inputs x 2 pipeline bufs x tile, resident output
    # block + d cache, plus weight/bias/attn scratch.  2x headroom.
    vmem_bytes = (2 * 2 * C * hw_tile * itemsize
                  + 2 * C_half_p * HW * itemsize
                  + C_half_p * HW * itemsize
                  + C_half_p * C_half_p * 4
                  + C_half_p * (C + 1) * itemsize)
    vmem_limit = int(min(128 * 1024 * 1024,
                         max(32 * 1024 * 1024, 2 * vmem_bytes)))

    flops = int(B * (4 * C_half_p * C * HW + 4 * C_half_p * C_half_p * HW))
    bytes_accessed = int(B * (2 * C * HW + C_half_p * HW) * itemsize
                         + C_half_p * (C + 1) * itemsize)
    cost = pl.CostEstimate(flops=flops,
                           transcendentals=int(B * C_half_p * C_half_p),
                           bytes_accessed=bytes_accessed)

    kernel = functools.partial(_dsa_kernel, c_half=C_half, c_half_p=C_half_p)

    out = pl.pallas_call(
        kernel,
        out_shape=jax.ShapeDtypeStruct((B, C_half_p, HW), dt),
        grid=(B, n_hw),
        in_specs=[
            pl.BlockSpec((None, C, hw_tile), lambda b, t: (b, 0, t)),
            pl.BlockSpec((None, C, hw_tile), lambda b, t: (b, 0, t)),
            pl.BlockSpec((C_half_p, C), lambda b, t: (0, 0)),
            pl.BlockSpec((C_half_p, 1), lambda b, t: (0, 0)),
        ],
        out_specs=pl.BlockSpec((None, C_half_p, HW), lambda b, t: (b, 0, 0)),
        scratch_shapes=[
            pltpu.VMEM((C_half_p, C_half_p), jnp.float32),
            pltpu.VMEM((C_half_p, HW), dt),
        ],
        compiler_params=pltpu.CompilerParams(
            dimension_semantics=("parallel", "arbitrary"),
            vmem_limit_bytes=vmem_limit),
        cost_estimate=cost,
    )(depth_flat, sem_flat, w_p, b_p)

    # Drop the zero-padded channels and restore NCHW.
    return out[:, :C_half, :].reshape(B, C_half, H, W)


def _reference(depth_feat, semantic_feat, weight, bias):
    # Pure-JAX reference mirroring the PyTorch forward.
    B, C, H, W = depth_feat.shape
    C_half = weight.shape[0]
    d = jnp.einsum('oc,bchw->bohw', weight, depth_feat) + bias[None, :, None, None]
    s = jnp.einsum('oc,bchw->bohw', weight, semantic_feat) + bias[None, :, None, None]
    df = d.reshape(B, C_half, H * W)
    sf = s.reshape(B, C_half, H * W)
    attn = jnp.einsum('bcn,bdn->bcd', df, sf)
    attn = jax.nn.softmax(attn, axis=-1)
    fused = jnp.einsum('bcd,bdn->bcn', attn, df).reshape(B, C_half, H, W)
    return fused + d


if __name__ == "__main__":
    key = jax.random.PRNGKey(0)
    k_d, k_s, k_w, k_b = jax.random.split(key, 4)

    B, C, H, W = 2, 4, 16, 16
    C_half = C // 2

    depth_feat = jax.random.normal(k_d, (B, C, H, W), dtype=jnp.float32)
    semantic_feat = jax.random.normal(k_s, (B, C, H, W), dtype=jnp.float32)
    # nn.Conv2d(C, C//2, 1): weight (C//2, C, 1, 1) squeezed -> (C//2, C); bias (C//2,)
    weight = jax.random.normal(k_w, (C_half, C), dtype=jnp.float32) * 0.1
    bias = jax.random.normal(k_b, (C_half,), dtype=jnp.float32) * 0.1

    ref = _reference(depth_feat, semantic_feat, weight, bias)

    # Default (auto) HW tile.
    out = dynamic_semantic_attention(depth_feat, semantic_feat, weight, bias)
    out = jax.block_until_ready(out)
    assert out.shape == (B, C_half, H, W)
    assert jnp.allclose(out, ref, atol=5e-3, rtol=5e-3), "mismatch (auto tile)"

    # Force multiple HW tiles to exercise the accumulate/finalize path.
    out_tiled = dynamic_semantic_attention(depth_feat, semantic_feat, weight,
                                           bias, hw_tile=128)
    out_tiled = jax.block_until_ready(out_tiled)
    assert jnp.allclose(out_tiled, ref, atol=5e-3, rtol=5e-3), "mismatch (tiled)"

    print("KERNEL_OK")
</pallas_src>

<mosaic_0001>
module attributes {stable_mosaic.version = 11 : i64} {
  func.func @_dsa_kernel(%arg0: i32, %arg1: i32, %arg2: memref<1x4x256xf32, #tpu.memory_space<vmem>>, %arg3: memref<1x4x256xf32, #tpu.memory_space<vmem>>, %arg4: memref<8x4xf32, #tpu.memory_space<vmem>>, %arg5: memref<8x1xf32, #tpu.memory_space<vmem>>, %arg6: memref<1x8x256xf32, #tpu.memory_space<vmem>>, %arg7: memref<8x8xf32, #tpu.memory_space<vmem>>, %arg8: memref<8x256xf32, #tpu.memory_space<vmem>>) attributes {dimension_semantics = [#tpu.dimension_semantics<parallel>, #tpu.dimension_semantics<arbitrary>], iteration_bounds = array<i64: 2, 1>, scalar_prefetch = 0 : i64, scratch_operands = 2 : i64, tpu.core_type = #tpu.core_type<tc>, window_params = [{transform_indices = @transform_0, window_bounds = array<i64: 1, 4, 256>}, {transform_indices = @transform_1, window_bounds = array<i64: 1, 4, 256>}, {pipeline_mode = #tpu.pipeline_mode<synchronous>, transform_indices = @transform_2, window_bounds = array<i64: 8, 4>}, {pipeline_mode = #tpu.pipeline_mode<synchronous>, transform_indices = @transform_3, window_bounds = array<i64: 8, 1>}, {transform_indices = @transform_4, window_bounds = array<i64: 1, 8, 256>}]} {
    %c0_i32 = arith.constant 0 : i32
    %0 = arith.cmpi eq, %arg1, %c0_i32 : i32
    %1 = arith.extui %0 : i1 to i32
    %c0_i32_0 = arith.constant 0 : i32
    %2 = arith.cmpi ne, %1, %c0_i32_0 : i32
    scf.if %2 {
      %cst_19 = arith.constant 0.000000e+00 : f32
      %26 = vector.broadcast %cst_19 : f32 to vector<8x8xf32>
      %c0_20 = arith.constant 0 : index
      %c0_21 = arith.constant 0 : index
      %27 = vector.load %arg7[%c0_20, %c0_21] : memref<8x8xf32, #tpu.memory_space<vmem>>, vector<8x8xf32>
      tpu.vector_store %arg7[%c0_20, %c0_21], %26 {strides = array<i32>} : memref<8x8xf32, #tpu.memory_space<vmem>>, vector<8x8xf32>,
    } else {
    }
    %c0 = arith.constant 0 : index
    %c0_1 = arith.constant 0 : index
    %3 = vector.load %arg4[%c0, %c0_1] : memref<8x4xf32, #tpu.memory_space<vmem>>, vector<8x4xf32>
    %c0_2 = arith.constant 0 : index
    %c0_3 = arith.constant 0 : index
    %4 = vector.load %arg5[%c0_2, %c0_3] : memref<8x1xf32, #tpu.memory_space<vmem>>, vector<8x1xf32>
    %c0_4 = arith.constant 0 : index
    %c0_5 = arith.constant 0 : index
    %c0_6 = arith.constant 0 : index
    %5 = vector.load %arg2[%c0_4, %c0_5, %c0_6] : memref<1x4x256xf32, #tpu.memory_space<vmem>>, vector<1x4x256xf32>
    %6 = vector.shape_cast %5 : vector<1x4x256xf32> to vector<4x256xf32>
    %cst = arith.constant dense<0.000000e+00> : vector<8x256xf32>
    %7 = tpu.matmul %3, %6, %cst {dimension_numbers = #tpu.dot_dimension_numbers<[1], [0], [0], [1], [0, 0, 1, 1], [], []>} : vector<8x4xf32>, vector<4x256xf32>, vector<8x256xf32> -> vector<8x256xf32>
    %8 = vector.broadcast %4 : vector<8x1xf32> to vector<8x256xf32>
    %9 = arith.addf %7, %8 : vector<8x256xf32>
    %c0_7 = arith.constant 0 : index
    %c0_8 = arith.constant 0 : index
    %c0_9 = arith.constant 0 : index
    %10 = vector.load %arg3[%c0_7, %c0_8, %c0_9] : memref<1x4x256xf32, #tpu.memory_space<vmem>>, vector<1x4x256xf32>
    %11 = vector.shape_cast %10 : vector<1x4x256xf32> to vector<4x256xf32>
    %cst_10 = arith.constant dense<0.000000e+00> : vector<8x256xf32>
    %12 = tpu.matmul %3, %11, %cst_10 {dimension_numbers = #tpu.dot_dimension_numbers<[1], [0], [0], [1], [0, 0, 1, 1], [], []>} : vector<8x4xf32>, vector<4x256xf32>, vector<8x256xf32> -> vector<8x256xf32>
    %13 = vector.broadcast %4 : vector<8x1xf32> to vector<8x256xf32>
    %14 = arith.addf %12, %13 : vector<8x256xf32>
    %c256_i32 = arith.constant 256 : i32
    %15 = arith.muli %arg1, %c256_i32 : i32
    %16 = tpu.assume_multiple %15, 128 : i32
    %c0_11 = arith.constant 0 : index
    %17 = arith.index_cast %16 : i32 to index
    %18 = vector.load %arg8[%c0_11, %17] : memref<8x256xf32, #tpu.memory_space<vmem>>, vector<8x256xf32>
    tpu.vector_store %arg8[%c0_11, %17], %9 {strides = array<i32>} : memref<8x256xf32, #tpu.memory_space<vmem>>, vector<8x256xf32>,
    %c0_12 = arith.constant 0 : index
    %c0_13 = arith.constant 0 : index
    %19 = vector.load %arg7[%c0_12, %c0_13] : memref<8x8xf32, #tpu.memory_space<vmem>>, vector<8x8xf32>
    %cst_14 = arith.constant dense<0.000000e+00> : vector<8x8xf32>
    %20 = tpu.matmul %9, %14, %cst_14 {dimension_numbers = #tpu.dot_dimension_numbers<[1], [1], [0], [0], [0, 0, 1, 0], [], []>} : vector<8x256xf32>, vector<8x256xf32>, vector<8x8xf32> -> vector<8x8xf32>
    %21 = arith.addf %19, %20 : vector<8x8xf32>
    %c0_15 = arith.constant 0 : index
    %c0_16 = arith.constant 0 : index
    %22 = vector.load %arg7[%c0_15, %c0_16] : memref<8x8xf32, #tpu.memory_space<vmem>>, vector<8x8xf32>
    tpu.vector_store %arg7[%c0_15, %c0_16], %21 {strides = array<i32>} : memref<8x8xf32, #tpu.memory_space<vmem>>, vector<8x8xf32>,
    %c0_i32_17 = arith.constant 0 : i32
    %23 = arith.cmpi eq, %arg1, %c0_i32_17 : i32
    %24 = arith.extui %23 : i1 to i32
    %c0_i32_18 = arith.constant 0 : i32
    %25 = arith.cmpi ne, %24, %c0_i32_18 : i32
    scf.if %25 {
      %c0_19 = arith.constant 0 : index
      %c0_20 = arith.constant 0 : index
      %26 = vector.load %arg7[%c0_19, %c0_20] : memref<8x8xf32, #tpu.memory_space<vmem>>, vector<8x8xf32>
      %27 = tpu.iota {dimensions = array<i32: 1>} : vector<8x8xi32>
      %c2_i32 = arith.constant 2 : i32
      %28 = vector.broadcast %c2_i32 : i32 to vector<8x8xi32>
      %29 = arith.cmpi slt, %27, %28 : vector<8x8xi32>
      %cst_21 = arith.constant -1.000000e+30 : f32
      %30 = vector.broadcast %cst_21 : f32 to vector<8x8xf32>
      %31 = arith.select %29, %26, %30 : vector<8x8xi1>, vector<8x8xf32>
      %cst_22 = arith.constant dense<0xFF800000> : vector<8xf32>
      %32 = vector.multi_reduction <maximumf>, %31, %cst_22 [1] : vector<8x8xf32> to vector<8xf32>
      %33 = vector.shape_cast %32 : vector<8xf32> to vector<8x1xf32>
      %34 = vector.broadcast %33 : vector<8x1xf32> to vector<8x8xf32>
      %35 = arith.subf %31, %34 : vector<8x8xf32>
      %36 = math.exp %35 : vector<8x8xf32>
      %cst_23 = arith.constant dense<0.000000e+00> : vector<8xf32>
      %37 = vector.multi_reduction <add>, %36, %cst_23 [1] : vector<8x8xf32> to vector<8xf32>
      %38 = vector.shape_cast %37 : vector<8xf32> to vector<8x1xf32>
      %39 = tpu.reciprocal %38 {approx = true} : vector<8x1xf32> -> vector<8x1xf32>
      %40 = vector.broadcast %39 : vector<8x1xf32> to vector<8x8xf32>
      %41 = arith.mulf %36, %40 : vector<8x8xf32>
      %c0_24 = arith.constant 0 : index
      %c0_25 = arith.constant 0 : index
      %42 = vector.load %arg8[%c0_24, %c0_25] : memref<8x256xf32, #tpu.memory_space<vmem>>, vector<8x256xf32>
      %cst_26 = arith.constant dense<0.000000e+00> : vector<8x256xf32>
      %43 = tpu.matmul %41, %42, %cst_26 {dimension_numbers = #tpu.dot_dimension_numbers<[1], [0], [0], [1], [0, 0, 1, 1], [], []>} : vector<8x8xf32>, vector<8x256xf32>, vector<8x256xf32> -> vector<8x256xf32>
      %44 = arith.addf %43, %42 : vector<8x256xf32>
      %c0_27 = arith.constant 0 : index
      %c0_28 = arith.constant 0 : index
      %c0_29 = arith.constant 0 : index
      %45 = vector.load %arg6[%c0_27, %c0_28, %c0_29] : memref<1x8x256xf32, #tpu.memory_space<vmem>>, vector<1x8x256xf32>
      %46 = vector.shape_cast %45 : vector<1x8x256xf32> to vector<8x256xf32>
      %47 = vector.shape_cast %44 : vector<8x256xf32> to vector<1x8x256xf32>
      tpu.vector_store %arg6[%c0_27, %c0_28, %c0_29], %47 {strides = array<i32>} : memref<1x8x256xf32, #tpu.memory_space<vmem>>, vector<1x8x256xf32>,
    } else {
    }
    return
  }
  func.func @transform_0(%arg0: i32, %arg1: i32) -> (i32, i32, i32) {
    %c0_i32 = arith.constant 0 : i32
    %c0_i32_0 = arith.constant 0 : i32
    return %arg0, %c0_i32, %arg1 : i32, i32, i32
  }
  func.func @transform_1(%arg0: i32, %arg1: i32) -> (i32, i32, i32) {
    %c0_i32 = arith.constant 0 : i32
    %c0_i32_0 = arith.constant 0 : i32
    return %arg0, %c0_i32, %arg1 : i32, i32, i32
  }
  func.func @transform_2(%arg0: i32, %arg1: i32) -> (i32, i32) {
    %c0_i32 = arith.constant 0 : i32
    %c0_i32_0 = arith.constant 0 : i32
    %c0_i32_1 = arith.constant 0 : i32
    return %c0_i32, %c0_i32_0 : i32, i32
  }
  func.func @transform_3(%arg0: i32, %arg1: i32) -> (i32, i32) {
    %c0_i32 = arith.constant 0 : i32
    %c0_i32_0 = arith.constant 0 : i32
    %c0_i32_1 = arith.constant 0 : i32
    return %c0_i32, %c0_i32_0 : i32, i32
  }
  func.func @transform_4(%arg0: i32, %arg1: i32) -> (i32, i32, i32) {
    %c0_i32 = arith.constant 0 : i32
    %c0_i32_0 = arith.constant 0 : i32
    %c0_i32_1 = arith.constant 0 : i32
    return %arg0, %c0_i32, %c0_i32_0 : i32, i32, i32
  }
}

</mosaic_0001>

<bundles_post_ra>
// kernel: tpu_custom_call.1
= control target key start
LH: loop header
LB: loop body
LE: loop exit
PB: predicated region body
PF: predicated region fallthrough
CT: control target
= control target key end

     0   :  { %9 = vsyncpa [#allocation5], 0  ;;  %s998_s0 = inlined_call_operand.vmem [shape: f32[2,4,256], index: 0, kind: input, shape index: {}]   ;;  %s999_s1 = inlined_call_operand.hbm [shape: f32[2,4,256], index: 1, kind: input, shape index: {}]   ;;  %s1000_s2 = inlined_call_operand.vmem [shape: f32[8,4], index: 2, kind: input, shape index: {}]   ;;  %s1001_s3 = inlined_call_operand.vmem [shape: f32[8,1], index: 3, kind: input, shape index: {}]   ;;  %s1002_s4 = inlined_call_operand.hbm [shape: f32[2,8,256], index: 4, kind: output, shape index: {}]  }
   0x1   :  { %11 = vsyncpa [#allocation5 + $0x1], 0 }
   0x2   :  { %12 = vsyncpa [#allocation6], 0 }
   0x3   :  { %14 = vsyncpa [#allocation6 + $0x1], 0  ;;  %s860_s15 = smov 0   ;;  %s862_s16 = smov 0  }
   0x4   :  { %s864_s17 = smov 0   ;;  %s866_s18 = smov 0  }
   0x5   :  { %s868_s19 = smov 0   ;;  %s870_s20 = smov 0  }
   0x6 LB: > { %s620_s21 = sadd.s32 4294967295, %s831_s20   ;;  %s621_s22 = sadd.s32 4294967294, %s831_s20   ;;  %s831_s20 = sphi %s870_s20, %s20_s20   ;;  %s827_s19 = sphi %s868_s19, %s1011_s19   ;;  %s823_s18 = sphi %s866_s18, %s1010_s18   ;;  %s819_s17 = sphi %s864_s17, %s1009_s17   ;;  %s815_s16 = sphi %s862_s16, %s1008_s16   ;;  %s811_s15 = sphi %s860_s15, %s1007_s15  }
   0x7   : > { %s32_s23 = sadd.s32 1, %s827_s19  ;;  %s69_s24 = sadd.s32 1, %s819_s17 }
   0x8   : > { %p34_p0 = scmp.ge.s32.totalorder %s32_s23, 2  ;;  %p76_p1 = scmp.ne.s32.totalorder %s819_s17, %s815_s16 }
   0x9   : > { %p77_p2 = scmp.eq.s32.totalorder %s831_s20, 0  ;;  %p82_p3 = scmp.ne.s32.totalorder %s815_s16, %s811_s15 }
   0xa   : > { %s1013_s23 = smov (%p34_p0, %s32_s23), 0  ;;  %p83_p5 = scmp.eq.s32.totalorder %s620_s21, 0 }
   0xb   : > { %p901_p4 = por %p77_p2, %p76_p1  ;;  %s64_s26 = ssub.s32 %s827_s19, %s1013_s23 }
   0xc   : > { %p148_p6 = scmp.eq.s32.totalorder %s620_s21, 1  ;;  %p67_p7 = scmp.eq.s32.totalorder %s64_s26, 0 }
   0xd   : > { %p907_p8 = por %p83_p5, %p82_p3  ;;  %p154_p10 = scmp.eq.s32.totalorder %s621_s22, 1 }
   0xe   : > { %p911_p9 = por %p148_p6, %p76_p1  ;;  %p623_p12 = scmp.ge.s32.totalorder %s831_s20, 2 }
   0xf   : > { %s916_s29 = scalar_select %p67_p7, %s819_s17, %s69_s24  }
  0x10   : > { %p918_p11 = por %p154_p10, %p82_p3  ;;  %p662_p13 = scmp.lt.s32.totalorder %s831_s20, 2 }
  0x11   : > { %s193_s5 = sand.u32 1, %s819_s17   ;;  %s647_s7 = sshll.u32 %s827_s19, 3 }
  0x12   : > { %s624_s6 = sshll.u32 %s193_s5, 3  ;;  %s204_s10 = scalar_lea.hbm %s999_s1, %s647_s7 }
  0x13   : > { %s197_s11 = scalar_lea.vmem [#allocation4], %s624_s6  ;;  %s206_s13 = sshll.u32 %s204_s10, 4  ;;  %s207_s13 = int_to_ptr.hbm [resolvable:$true] %s206_s13 }
  0x14   : > { %s208_s12 = sshll.u32 %s197_s11, 4  ;;  %p655_p0 = pnand %p662_p13, %p901_p4  ;;  %s209_s12 = int_to_ptr.vmem [resolvable:$true] %s208_s12 }
  0x15   : > { %p627_p1 = scmp.ge.s32.totalorder %s831_s20, 1  ;;  %p213_p2 = scmp.lt.s32.totalorder %s831_s20, 3 }
  0x16   : > { %s194_s14 = scalar_lea.sflag [#allocation5], %s193_s5 }
  0x17   : > { %657 = dma.hbm_to_vmem [thread:$0]  (!%p655_p0), %s207_s13, 128, %s209_s12, %s194_s14  }
  0x18   : > { %p214_p3 = pnand %p627_p1, %p213_p2 }
  0x19   : > { %s934_s21 = sand.u32 (!%p214_p3), 1, %s815_s16  }
  0x1a   : > { %217 = sbr.rel (%p214_p3) target bundleno = 724 (0x2d4), region = 36  ;;  %s628_s22 = sshll.u32 (!%p214_p3), %s934_s21, 3 }
  0x1b   : > { %s220_s24 = scalar_lea.sflag (!%p214_p3), [#allocation5], %s934_s21  ;;  %s223_s26 = scalar_lea.vmem (!%p214_p3), [#allocation4], %s628_s22 }
  0x1f   : > { %802 = dma.done.wait (%p907_p8), %s220_s24, 128  }
  0x20   : > { %804 = vsyncadd (%p907_p8), %s220_s24, 4294967168  ;;  %p259_p4 = scmp.lt.s32.totalorder %s823_s18, 1  ;;  %v833_v0 = vmov 0   ;;  %v276_v2 = vld [vmem:[%s1001_s3] sm:$0xff]  ;;  %v336_v3 = vld [vmem:[%s223_s26] sm:$0xff]  ;;  %vm291_vm0 = vcmask 1043456   ;;  %v440_v23 = vlaneseq }
  0x21   : > { %714 = vset.pattern.permute.xlu0 %v833_v0  ;;  %v275_v6 = vld [vmem:[%s1000_s2] sm:$0xff]  ;;  %vm287_vm1 = vcmask 31744   ;;  %vm273_vm2 = vcmask 64512   ;;  %v834_v18 = vmov 0.0   ;;  %s629_s12 = sshll.u32 %s934_s21, 4  ;;  %s649_s13 = sshll.u32 %s823_s18, 4 }
  0x22   : > { %s260_s25 = scalar_select %p259_p4, %s823_s18, 1  ;;  %280 = vperm.xlu0 %714, %v276_v2   ;;  %274 = vst.msk [vmem:[#allocation2] sm:$0xff] %vm273_vm2, %v834_v18  ;;  %v441_v25 = vand.u32 127, %v440_v23 }
  0x23   : > { %s514_s24 = scalar_lea.hbm %s1002_s4, %s649_s13  ;;  %s257_s26 = scalar_lea.vmem [#allocation7], %s629_s12 }
  0x24   : > { %s648_s5 = sshll.u32 %s260_s25, 3  ;;  %vm442_vm3 = vcmp.lt.s32.totalorder %v441_v25, 2  ;;  %s516_s25 = sshll.u32 %s257_s26, 4  ;;  %s517_s25 = int_to_ptr.vmem [resolvable:$true] %s516_s25 }
  0x25   : > { %s266_s8 = scalar_lea.vmem %s998_s0, %s648_s5  ;;  %s518_s5 = sshll.u32 %s514_s24, 4  ;;  %s519_s5 = int_to_ptr.hbm [resolvable:$true] %s518_s5 }
  0x26   : > { %v277_v1 = vld [vmem:[%s266_s8] sm:$0xff]  ;;  %s503_s6 = scalar_lea.sflag [#allocation6], %s934_s21  ;;  %s763_s7 = sshra.s32 %s519_s5, 4  ;;  %s764_s7 = int_to_ptr.hbm [resolvable:$true] %s763_s7 }
  0x27   : > { %284 = vst [vmem:[#allocation1] ss:$2 sm:$0xff] %v277_v1  ;;  %s765_s18 = scalar_lea.hbm %s764_s7, 16  ;;  %s769_s10 = scalar_lea.hbm %s1002_s4, 32 }
  0x28   : > { %p766_p5 = scmp.ne.s32.totalorder %s764_s7, %s765_s18  ;;  %p770_p8 = scmp.lt.s32.totalorder %s764_s7, %s1002_s4 }
  0x29   : > { %v392_v20 = vld [vmem:[#allocation2] sm:$0xff]  ;;  %p771_p10 = scmp.lt.s32.totalorder %s769_s10, %s765_s18 }
  0x2a   : > { %p767_p6 = pnand %p766_p5, %p911_p9 }
  0x2b   : > { %p772_p13 = por %p771_p10, %p770_p8 }
  0x2c   : > { %p768_p7 = pneg %p767_p6 }
  0x2e   : > { %v285_v4 = vld.sshfl [vmem:[#allocation1] sm:$0xff pattern:$0x75316420]  ;;  %v286_v5 = vld.sshfl [vmem:[#allocation1 + $0x8] sm:$0xff pattern:$0x75316420]  ;;  %p773_p0 = pnand %p772_p13, %p768_p7 }
  0x2f   : > { %338 = vst [vmem:[#allocation1] ss:$2 sm:$0xff] %v336_v3  ;;  %632 = vmatpush.msk.msra.mxu0 %vm291_vm0, %v285_v4  ;;  %634 = vmatpush.msk.msra.mxu1 %vm291_vm0, %v286_v5 }
  0x30   : > { %633 = vmatmul.msk.f32.vlgmr.msra.gmra.mxu0 %vm287_vm1, %v275_v6  ;;  %635 = vmatmul.msk.f32.vlgmr.msra.gmra.mxu1 %vm287_vm1, %v275_v6 }
  0x36   : > { %v339_v7 = vld.sshfl [vmem:[#allocation1] sm:$0xff pattern:$0x75316420]  ;;  %v340_v8 = vld.sshfl [vmem:[#allocation1 + $0x8] sm:$0xff pattern:$0x75316420] }
  0x37   : > { %636 = vmatpush.msk.msra.mxu2 %vm291_vm0, %v339_v7  ;;  %638 = vmatpush.msk.msra.mxu3 %vm291_vm0, %v340_v8 }
  0x38   : > { %637 = vmatmul.msk.f32.vlgmr.msra.gmra.mxu2 %vm287_vm1, %v275_v6  ;;  %639 = vmatmul.msk.f32.vlgmr.msra.gmra.mxu3 %vm287_vm1, %v275_v6 }
  0x94   : > { %v281_v9 = vpop.permute.xlu0 %280 }
  0xad   : > { %v313_v10 = vpop.f32.mrf.mxu0  ;;  %v333_v11 = vpop.f32.mrf.mxu1 }
  0xae   : > { %v314_v12 = vadd.f32 %v313_v10, %v281_v9  ;;  %v334_v13 = vadd.f32 %v333_v11, %v281_v9 }
  0xb0   : > { %475 = vmatpush.msrb.mxu2 %v314_v12  ;;  %495 = vmatpush.msrb.mxu3 %v334_v13 }
  0xbb   : > { %v362_v14 = vpop.f32.mrf.mxu2  ;;  %v382_v15 = vpop.f32.mrf.mxu3 }
  0xbc   : > { %v363_v16 = vadd.f32 %v362_v14, %v281_v9  ;;  %v383_v17 = vadd.f32 %v382_v15, %v281_v9 }
  0xbe   : > { %408 = vmatpush.xpose.msrb.mxu0 %v363_v16  ;;  %428 = vmatpush.xpose.msrb.mxu1 %v383_v17 }
  0xc1   : > { %409 = vmatmul.f32.vlgmr.msrb.gmra.mxu0 %v314_v12  ;;  %429 = vmatmul.f32.vlgmr.msrb.gmra.mxu1 %v334_v13 }
 0x13e   : > { %v410_v19 = vpop.f32.mrf.mxu0  ;;  %v430_v21 = vpop.f32.mrf.mxu1 }
 0x13f   : > { %v431_v22 = vadd.f32 %v430_v21, %v410_v19 }
 0x141   : > { %v433_v24 = vadd.f32 %v431_v22, %v392_v20 }
 0x143   : > { %435 = vst.msk [vmem:[#allocation2] sm:$0xff] %vm273_vm2, %v433_v24 }
 0x14a   : > { %v439_v26 = vld [vmem:[#allocation2] sm:$0xff] }
 0x14b   : > { %v443_v27 = vsel %vm442_vm3, %v439_v26, -1e+30 }
 0x14c   : > { %v444_v28 = vsel %vm273_vm2, %v443_v27, -inf }
 0x14d   : > { %445 = vmax.xlane.f32.xlu0 %v444_v28 }
 0x1c0   : > { %v446_v29 = vpop.xlane.xlu0 %445 }
 0x1c1   : > { %v447_v30 = vsub.f32 %v443_v27, %v446_v29 }
 0x1c3   : > { %v448_v31 = vmul.f32 1.442695, %v447_v30 }
 0x1c5   : > { %715 = vpow2.f32 %v448_v31 }
 0x1cb   : > { %v716_v32 = vpop.eup %715 }
 0x1cc   : > { %v450_v33 = vsel %vm273_vm2, %v716_v32, 0.0 }
 0x1cd   : > { %451 = vadd.xlane.f32.xlu1 %v450_v33 }
 0x240   : > { %v452_v34 = vpop.xlane.xlu1 %451 }
 0x241   : > { %717 = vrcp.f32 %v452_v34 }
 0x247   : > { %v718_v35 = vpop.eup %717 }
 0x248   : > { %v454_v36 = vmul.f32 %v718_v35, %v716_v32 }
 0x24a   : > { %640 = vmatmul.msk.f32.vlgmr.msrb.gmra.mxu2 %vm273_vm2, %v454_v36  ;;  %641 = vmatmul.msk.f32.vlgmr.msrb.gmra.mxu3 %vm273_vm2, %v454_v36 }
 0x2cd   : > { %v477_v37 = vpop.f32.mrf.mxu2  ;;  %v497_v38 = vpop.f32.mrf.mxu3 }
 0x2ce   : > { %v478_v39 = vadd.f32 %v477_v37, %v314_v12  ;;  %v498_v40 = vadd.f32 %v497_v38, %v334_v13 }
 0x2d0   : > { %500 = vst [vmem:[%s257_s26] sm:$0xff] %v478_v39 }
 0x2d1   : > { %501 = vst [vmem:[%s257_s26 + $0x8] sm:$0xff] %v498_v40 }
 0x2d2   : > { %776 = shalt.err (!%p773_p0)
}
 0x2d3   : > { %652 = dma.vmem_to_hbm [thread:$0]  (%p911_p9), %s517_s25, 256, %s519_s5, %s503_s6  }
 0x2d4 PF: > { %s530_s21 = sand.u32 1, %s811_s15   ;;  %p659_p1 = pnand %p623_p12, %p918_p11 }
 0x2d5   : > { %s531_s12 = scalar_lea.sflag [#allocation6], %s530_s21 }
 0x2d6   : > { %p660_p2 = pneg %p659_p1 }
 0x2d8   : > { %806 = dma.done.wait (%p660_p2), %s531_s12, 256  }
 0x2d9   : > { %808 = vsyncadd (%p660_p2), %s531_s12, 4294967040  ;;  %s20_s20 = sadd.s32 1, %s831_s20   ;;  %s1007_s15 = smov %s815_s16 }
 0x2da   : > { %p17_p3 = scmp.ge.s32.totalorder %s20_s20, 4   ;;  %s1008_s16 = smov %s819_s17 }
 0x2db   : > { %s1009_s17 = smov %s916_s29  ;;  %s1010_s18 = smov %s827_s19 }
 0x2dc   : > { %s1011_s19 = smov %s1013_s23  ;;  %19 = sbr.rel (!%p17_p3) target bundleno = 6 (0x6), region = 93 }
 0x2e1   :  { %537 = vsyncpa [#allocation5], 1 }
 0x2e2   :  { %539 = vsyncpa [#allocation5 + $0x1], 1 }
 0x2e3   :  { %540 = vsyncpa [#allocation6], 1 }
 0x2e4   :  { %542 = vsyncpa [#allocation6 + $0x1], 1 }

</bundles_post_ra>
